<compile_context>
chip_gen: v7x
topology: tpu7x:2x2x1
jax: 0.10.0
libtpu: 0.0.40
codegen_flags: <defaults>
</compile_context>

<pallas_src>
import math

import jax
import jax.numpy as jnp
from jax.experimental import pallas as pl
from jax.experimental.pallas import tpu as pltpu

_LANES = 128
_MAX_TILE_ROWS = 1024  # 1024 * 128 * 4 B = 512 KiB per f32 block


def _make_avg_kernel(num_inputs):
    inv_k = 1.0 / float(num_inputs)

    def kernel(*refs):
        # refs = (in_0, ..., in_{K-1}, out)
        out_ref = refs[-1]
        acc = refs[0][...].astype(jnp.float32)
        for r in refs[1:num_inputs]:
            acc = acc + r[...].astype(jnp.float32)
        out_ref[...] = (acc * inv_k).astype(out_ref.dtype)

    return kernel


def avg(x):
    """Pallas implementation of AVG.forward.

    If `x` is a list/tuple of equally-shaped arrays, returns their elementwise
    mean (computed in a tiled Pallas kernel).  Otherwise returns `x` unchanged
    (pure identity — no kernel launch needed).
    """
    if not isinstance(x, (list, tuple)):
        return x

    xs = list(x)
    k = len(xs)
    shape = xs[0].shape
    out_dtype = xs[0].dtype
    size = math.prod(shape) if shape else 1

    # Flatten to a lane-dense 2-D slab (rows, 128) and tile the row axis.
    rows = pl.cdiv(size, _LANES)
    tile_rows = min(_MAX_TILE_ROWS, max(8, ((rows + 7) // 8) * 8))
    rows_padded = ((rows + tile_rows - 1) // tile_rows) * tile_rows
    padded_size = rows_padded * _LANES

    def to_slab(a):
        flat = a.reshape(-1)
        if padded_size != size:
            # Zero-pad the tail so the last tile is full.  (For aligned sizes,
            # like the demo below, this is a no-op and costs nothing.)
            flat = jnp.pad(flat, (0, padded_size - size))
        return flat.reshape(rows_padded, _LANES)

    slabs = [to_slab(a) for a in xs]

    grid = (rows_padded // tile_rows,)
    block = pl.BlockSpec((tile_rows, _LANES), lambda i: (i, 0))

    out2d = pl.pallas_call(
        _make_avg_kernel(k),
        out_shape=jax.ShapeDtypeStruct((rows_padded, _LANES), out_dtype),
        grid=grid,
        in_specs=[block] * k,
        out_specs=block,
        compiler_params=pltpu.CompilerParams(
            dimension_semantics=("parallel",)),
    )(*slabs)

    return out2d.reshape(-1)[:size].reshape(shape)


def avg_reference(x):
    """Pure-JAX reference mirroring the PyTorch module."""
    if isinstance(x, (list, tuple)):
        return sum(x) / len(x)
    return x


if __name__ == "__main__":
    key = jax.random.PRNGKey(0)
    keys = jax.random.split(key, 3)
    shape = (2, 4, 16, 16)  # small NCHW tensors, as the module would see
    xs = [jax.random.normal(kk, shape, jnp.float32) for kk in keys]

    # List input path (the interesting one): elementwise mean via the kernel.
    out = avg(xs)
    jax.block_until_ready(out)

    ref = avg_reference(xs)
    assert out.shape == shape, out.shape
    assert jnp.allclose(out, ref, atol=1e-6, rtol=1e-6), float(
        jnp.max(jnp.abs(out - ref)))

    # Non-list input path: identity, no kernel launch.
    out_single = avg(xs[0])
    assert out_single is xs[0]

    print("KERNEL_OK")
</pallas_src>

<mosaic_0001>
module attributes {stable_mosaic.version = 11 : i64} {
  func.func @kernel(%arg0: i32, %arg1: memref<16x128xf32, #tpu.memory_space<vmem>>, %arg2: memref<16x128xf32, #tpu.memory_space<vmem>>, %arg3: memref<16x128xf32, #tpu.memory_space<vmem>>, %arg4: memref<16x128xf32, #tpu.memory_space<vmem>>) attributes {dimension_semantics = [#tpu.dimension_semantics<parallel>], iteration_bounds = array<i64: 1>, scalar_prefetch = 0 : i64, scratch_operands = 0 : i64, tpu.core_type = #tpu.core_type<tc>, window_params = [{transform_indices = @transform_0, window_bounds = array<i64: 16, 128>}, {transform_indices = @transform_1, window_bounds = array<i64: 16, 128>}, {transform_indices = @transform_2, window_bounds = array<i64: 16, 128>}, {transform_indices = @transform_3, window_bounds = array<i64: 16, 128>}]} {
    %c0 = arith.constant 0 : index
    %c0_0 = arith.constant 0 : index
    %0 = vector.load %arg1[%c0, %c0_0] : memref<16x128xf32, #tpu.memory_space<vmem>>, vector<16x128xf32>
    %c0_1 = arith.constant 0 : index
    %c0_2 = arith.constant 0 : index
    %1 = vector.load %arg2[%c0_1, %c0_2] : memref<16x128xf32, #tpu.memory_space<vmem>>, vector<16x128xf32>
    %2 = arith.addf %0, %1 : vector<16x128xf32>
    %c0_3 = arith.constant 0 : index
    %c0_4 = arith.constant 0 : index
    %3 = vector.load %arg3[%c0_3, %c0_4] : memref<16x128xf32, #tpu.memory_space<vmem>>, vector<16x128xf32>
    %4 = arith.addf %2, %3 : vector<16x128xf32>
    %cst = arith.constant 0.333333343 : f32
    %5 = vector.broadcast %cst : f32 to vector<16x128xf32>
    %6 = arith.mulf %4, %5 : vector<16x128xf32>
    %c0_5 = arith.constant 0 : index
    %c0_6 = arith.constant 0 : index
    %7 = vector.load %arg4[%c0_5, %c0_6] : memref<16x128xf32, #tpu.memory_space<vmem>>, vector<16x128xf32>
    tpu.vector_store %arg4[%c0_5, %c0_6], %6 {strides = array<i32>} : memref<16x128xf32, #tpu.memory_space<vmem>>, vector<16x128xf32>,
    return
  }
  func.func @transform_0(%arg0: i32) -> (i32, i32) {
    %c0_i32 = arith.constant 0 : i32
    %c0_i32_0 = arith.constant 0 : i32
    return %arg0, %c0_i32 : i32, i32
  }
  func.func @transform_1(%arg0: i32) -> (i32, i32) {
    %c0_i32 = arith.constant 0 : i32
    %c0_i32_0 = arith.constant 0 : i32
    return %arg0, %c0_i32 : i32, i32
  }
  func.func @transform_2(%arg0: i32) -> (i32, i32) {
    %c0_i32 = arith.constant 0 : i32
    %c0_i32_0 = arith.constant 0 : i32
    return %arg0, %c0_i32 : i32, i32
  }
  func.func @transform_3(%arg0: i32) -> (i32, i32) {
    %c0_i32 = arith.constant 0 : i32
    %c0_i32_0 = arith.constant 0 : i32
    return %arg0, %c0_i32 : i32, i32
  }
}

</mosaic_0001>

<bundles_post_ra>
// kernel: tpu_custom_call.1
= control target key start
LH: loop header
LB: loop body
LE: loop exit
PB: predicated region body
PF: predicated region fallthrough
CT: control target
= control target key end

     0   :  { %8 = vsyncpa [#allocation3], 0  ;;  %s281_s0 = inlined_call_operand.hbm [shape: f32[16,128], index: 0, kind: input, shape index: {}]   ;;  %s282_s1 = inlined_call_operand.hbm [shape: f32[16,128], index: 1, kind: input, shape index: {}]   ;;  %s283_s2 = inlined_call_operand.hbm [shape: f32[16,128], index: 2, kind: input, shape index: {}]   ;;  %s284_s3 = inlined_call_operand.hbm [shape: f32[16,128], index: 3, kind: output, shape index: {}]  }
   0x1   :  { %9 = vsyncpa [#allocation6], 0 }
   0x2   :  { %10 = vsyncpa [#allocation4], 0  ;;  %s188_s12 = smov [#allocation5]   ;;  %s189_s14 = smov [#allocation2]  }
   0x3   :  { %s28_s13 = sshll.u32 %s188_s12, 4  ;;  %s16_s15 = sshll.u32 %s189_s14, 4  ;;  %s29_s13 = int_to_ptr.vmem [resolvable:$true] %s28_s13  ;;  %s214_s15 = int_to_ptr.vmem [resolvable:$true] %s16_s15 }
   0x4   :  { %s94_s18 = scalar_lea.hbm %s282_s1, 256 }
   0x5   :  { %p95_p0 = scmp.ne.s32.totalorder %s282_s1, %s94_s18  ;;  %p98_p1 = scmp.lt.u32.totalorder %s94_s18, %s282_s1 }
   0x7   :  { %p100_p2 = pnand %p98_p1, %p95_p0 }
   0x9   :  { %103 = shalt.err (!%p100_p2)
}
   0xa   :  { %s104_s23 = scalar_lea.vmem %s29_s13, 256  ;;  %p109_p4 = scmp.lt.s32.totalorder %s29_s13, %s29_s13 }
   0xb   :  { %p105_p3 = scmp.ne.s32.totalorder %s29_s13, %s104_s23  ;;  %p110_p5 = scmp.lt.s32.totalorder %s104_s23, %s104_s23 }
   0xd   :  { %p111_p6 = por %p110_p5, %p109_p4 }
   0xf   :  { %p112_p7 = pnand %p111_p6, %p105_p3 }
  0x11   :  { %115 = shalt.err (!%p112_p7)
}
  0x12   :  { %s190_s24 = smov 128   ;;  %s191_s25 = smov 8  }
  0x13   :  { %34 = dma.hbm_to_vmem [thread:$0]  %s282_s1, 256, %s29_s13, [#allocation6], %s190_s24, %s190_s24, %s191_s25  }
  0x14   :  { %s116_s30 = scalar_lea.hbm %s281_s0, 256 }
  0x15   :  { %p117_p8 = scmp.ne.s32.totalorder %s281_s0, %s116_s30  ;;  %p120_p9 = scmp.lt.u32.totalorder %s116_s30, %s281_s0 }
  0x17   :  { %p122_p10 = pnand %p120_p9, %p117_p8 }
  0x19   :  { %125 = shalt.err (!%p122_p10)
}
  0x1a   :  { %s126_s8 = scalar_lea.vmem %s214_s15, 256  ;;  %p131_p12 = scmp.lt.s32.totalorder %s214_s15, %s214_s15 }
  0x1b   :  { %p127_p11 = scmp.ne.s32.totalorder %s214_s15, %s126_s8  ;;  %p132_p13 = scmp.lt.s32.totalorder %s126_s8, %s126_s8 }
  0x1d   :  { %p133_p0 = por %p132_p13, %p131_p12 }
  0x1f   :  { %p134_p1 = pnand %p133_p0, %p127_p11 }
  0x21   :  { %137 = shalt.err (!%p134_p1)
}
  0x22   :  { %22 = dma.hbm_to_vmem [thread:$0]  %s281_s0, 256, %s214_s15, [#allocation3], %s190_s24, %s190_s24, %s191_s25  }
  0x23   :  { %s192_s10 = smov [#allocation7]   ;;  %s138_s14 = scalar_lea.hbm %s283_s2, 256 }
  0x24   :  { %s40_s11 = sshll.u32 %s192_s10, 4  ;;  %p139_p2 = scmp.ne.s32.totalorder %s283_s2, %s138_s14  ;;  %s41_s11 = int_to_ptr.vmem [resolvable:$true] %s40_s11 }
  0x25   :  { %p142_p3 = scmp.lt.u32.totalorder %s138_s14, %s283_s2 }
  0x27   :  { %p144_p4 = pnand %p142_p3, %p139_p2 }
  0x29   :  { %147 = shalt.err (!%p144_p4)
}
  0x2a   :  { %s148_s20 = scalar_lea.vmem %s41_s11, 256  ;;  %p153_p6 = scmp.lt.s32.totalorder %s41_s11, %s41_s11 }
  0x2b   :  { %p149_p5 = scmp.ne.s32.totalorder %s41_s11, %s148_s20  ;;  %p154_p7 = scmp.lt.s32.totalorder %s148_s20, %s148_s20 }
  0x2d   :  { %p155_p8 = por %p154_p7, %p153_p6 }
  0x2f   :  { %p156_p9 = pnand %p155_p8, %p149_p5 }
  0x31   :  { %159 = shalt.err (!%p156_p9)
}
  0x32   :  { %46 = dma.hbm_to_vmem [thread:$0]  %s283_s2, 256, %s41_s11, [#allocation6], %s190_s24, %s190_s24, %s191_s25  }
  0x33   :  { %182 = dma.done.wait [#allocation3], 256  }
  0x34   :  { %183 = vsyncadd [#allocation3], 4294967040 }
  0x35   :  { %184 = dma.done.wait [#allocation6], 512  }
  0x36   :  { %185 = vsyncadd [#allocation6], 4294966784  ;;  %v56_v0 = vld [vmem:[#allocation2] sm:$0xff]  ;;  %v58_v1 = vld [vmem:[#allocation5] sm:$0xff]  ;;  %s193_s21 = smov [#allocation8]  }
  0x37   :  { %v62_v2 = vld [vmem:[#allocation7] sm:$0xff]  ;;  %v60_v3 = vadd.f32 %v58_v1, %v56_v0  ;;  %v57_v4 = vld [vmem:[#allocation2 + $0x8] sm:$0xff]  ;;  %v59_v5 = vld [vmem:[#allocation5 + $0x8] sm:$0xff]  ;;  %s75_s22 = sshll.u32 %s193_s21, 4  ;;  %s76_s22 = int_to_ptr.vmem [resolvable:$true] %s75_s22 }
  0x38   :  { %v63_v6 = vld [vmem:[#allocation7 + $0x8] sm:$0xff]  ;;  %v61_v7 = vadd.f32 %v59_v5, %v57_v4  ;;  %s160_s2 = scalar_lea.vmem %s76_s22, 256  ;;  %p165_p11 = scmp.lt.s32.totalorder %s76_s22, %s76_s22 }
  0x39   :  { %v64_v8 = vadd.f32 %v62_v2, %v60_v3  ;;  %p161_p10 = scmp.ne.s32.totalorder %s76_s22, %s160_s2  ;;  %p166_p12 = scmp.lt.s32.totalorder %s160_s2, %s160_s2 }
  0x3a   :  { %v65_v9 = vadd.f32 %v63_v6, %v61_v7 }
  0x3b   :  { %v66_v10 = vmul.f32 0.33333334, %v64_v8  ;;  %p167_p13 = por %p166_p12, %p165_p11 }
  0x3c   :  { %v67_v11 = vmul.f32 0.33333334, %v65_v9 }
  0x3d   :  { %68 = vst [vmem:[#allocation8] sm:$0xff] %v66_v10  ;;  %p168_p0 = pnand %p167_p13, %p161_p10 }
  0x3e   :  { %69 = vst [vmem:[#allocation8 + $0x8] sm:$0xff] %v67_v11 }
  0x3f   :  { %171 = shalt.err (!%p168_p0)
}
  0x40   :  { %s172_s27 = scalar_lea.hbm %s284_s3, 256 }
  0x41   :  { %p173_p1 = scmp.ne.s32.totalorder %s284_s3, %s172_s27  ;;  %p176_p2 = scmp.lt.u32.totalorder %s172_s27, %s284_s3 }
  0x43   :  { %p178_p3 = pnand %p176_p2, %p173_p1 }
  0x45   :  { %181 = shalt.err (!%p178_p3)
}
  0x46   :  { %81 = dma.vmem_to_hbm [thread:$0]  %s76_s22, 256, %s284_s3, [#allocation4], %s190_s24, %s190_s24, %s191_s25  }
  0x47   :  { %186 = dma.done.wait [#allocation4], 256  }
  0x48   :  { %187 = vsyncadd [#allocation4], 4294967040 }
  0x49   :  { %85 = vsyncpa [#allocation3], 1 }
  0x4a   :  { %86 = vsyncpa [#allocation6], 1 }
  0x4b   :  { %87 = vsyncpa [#allocation4], 1 }

</bundles_post_ra>
